<compile_context>
chip_gen: v5e
topology: v5e:2x2
jax: 0.10.0
libtpu: 0.0.40
codegen_flags: <defaults>
</compile_context>

<pallas_src>
import functools

import jax
import jax.numpy as jnp
from jax import lax
from jax.experimental import pallas as pl
from jax.experimental.pallas import tpu as pltpu

EPS = 1e-8
_LANES = 128
_SUBLANES = 8
_DEFAULT_BLOCK_ROWS = 2048  # 2048 * 128 * 4B = 1 MiB per input block


# ----------------------------------------------------------------------------
# Kernels (beta / n / block_rows are compile-time Python constants via partial)
# ----------------------------------------------------------------------------
def _pow_loss(p, t, beta):
    d = jnp.abs(p.astype(jnp.float32) - t.astype(jnp.float32)) + jnp.float32(EPS)
    if beta == 1.0:
        return d
    if beta == 2.0:
        return d * d
    # x ** beta for x > 0 and static float beta -> exp(beta * log(x)) (EUP)
    return jnp.exp(jnp.float32(beta) * jnp.log(d))


def _gmadl_partial_sums_kernel(pred_ref, true_ref, out_ref, *, beta, n, block_rows):
    """Per-block partial sums of (|pred - true| + eps) ** beta.

    Each grid step reduces its (block_rows, 128) tile to an (8, 128) vreg of
    partial sums using only elementwise VPU adds (no per-step cross-lane XLU
    reduce, no serialized scalar accumulator).  Padded / out-of-bounds
    elements are masked so they contribute exactly 0.
    """
    i = pl.program_id(0)
    loss = _pow_loss(pred_ref[...], true_ref[...], beta)

    row = lax.broadcasted_iota(jnp.int32, (block_rows, _LANES), 0)
    lane = lax.broadcasted_iota(jnp.int32, (block_rows, _LANES), 1)
    flat_idx = (i * block_rows + row) * _LANES + lane
    loss = jnp.where(flat_idx < n, loss, jnp.float32(0.0))

    out_ref[...] = jnp.sum(
        loss.reshape(block_rows // _SUBLANES, _SUBLANES, _LANES), axis=0
    )


def _gmadl_elem_kernel(pred_ref, true_ref, out_ref, *, beta):
    """Per-element loss (reduction='none').  Padded positions are discarded by
    the wrapper's slice, so no masking is required here."""
    out_ref[...] = _pow_loss(pred_ref[...], true_ref[...], beta).astype(out_ref.dtype)


# ----------------------------------------------------------------------------
# Wrapper helpers
# ----------------------------------------------------------------------------
def _current_beta(beta_start, beta_end, total_epochs, current_epoch):
    if total_epochs <= 1:
        return float(beta_end)
    progress = min(current_epoch / (total_epochs - 1), 1.0)
    return float(beta_start + (beta_end - beta_start) * progress)


def _to_slab(x):
    """Flatten row-major and view as (rows, 128).  Only copies (pads) when the
    element count is not a multiple of 128; otherwise it is a free reshape."""
    n = x.size
    flat = x.reshape(-1)
    rem = n % _LANES
    if rem:
        flat = jnp.pad(flat, (0, _LANES - rem))
    return flat.reshape(-1, _LANES)


def _choose_block_rows(rows):
    r8 = ((rows + _SUBLANES - 1) // _SUBLANES) * _SUBLANES
    return min(_DEFAULT_BLOCK_ROWS, r8)


# ----------------------------------------------------------------------------
# Jitted runners
# ----------------------------------------------------------------------------
@functools.partial(jax.jit, static_argnames=("beta", "reduction"))
def _gmadl_reduced(pred, true, *, beta, reduction):
    pred, true = jnp.broadcast_arrays(pred, true)
    n = pred.size
    pred2d = _to_slab(pred)
    true2d = _to_slab(true)
    rows = pred2d.shape[0]
    block_rows = _choose_block_rows(rows)
    nb = -(-rows // block_rows)

    kernel = functools.partial(
        _gmadl_partial_sums_kernel, beta=beta, n=n, block_rows=block_rows
    )
    partials = pl.pallas_call(
        kernel,
        out_shape=jax.ShapeDtypeStruct((nb * _SUBLANES, _LANES), jnp.float32),
        grid=(nb,),
        in_specs=[
            pl.BlockSpec((block_rows, _LANES), lambda i: (i, 0)),
            pl.BlockSpec((block_rows, _LANES), lambda i: (i, 0)),
        ],
        out_specs=pl.BlockSpec((_SUBLANES, _LANES), lambda i: (i, 0)),
        compiler_params=pltpu.CompilerParams(
            dimension_semantics=("parallel",),  # shards across v7x TensorCores
        ),
    )(pred2d, true2d)

    total = jnp.sum(partials)  # tiny (nb*8, 128) reduction done by XLA
    if reduction == "mean":
        return total / jnp.float32(n)
    return total  # 'sum'


@functools.partial(jax.jit, static_argnames=("beta",))
def _gmadl_none(pred, true, *, beta):
    pred, true = jnp.broadcast_arrays(pred, true)
    out_dtype = jnp.promote_types(pred.dtype, true.dtype)
    orig_shape = pred.shape
    n = pred.size
    pred2d = _to_slab(pred)
    true2d = _to_slab(true)
    rows = pred2d.shape[0]
    block_rows = _choose_block_rows(rows)
    nb = -(-rows // block_rows)

    kernel = functools.partial(_gmadl_elem_kernel, beta=beta)
    out2d = pl.pallas_call(
        kernel,
        out_shape=jax.ShapeDtypeStruct((rows, _LANES), out_dtype),
        grid=(nb,),
        in_specs=[
            pl.BlockSpec((block_rows, _LANES), lambda i: (i, 0)),
            pl.BlockSpec((block_rows, _LANES), lambda i: (i, 0)),
        ],
        out_specs=pl.BlockSpec((block_rows, _LANES), lambda i: (i, 0)),
        compiler_params=pltpu.CompilerParams(dimension_semantics=("parallel",)),
    )(pred2d, true2d)
    return out2d.reshape(-1)[:n].reshape(orig_shape)


# ----------------------------------------------------------------------------
# Public API (mirrors AdaptiveGMADLLoss.forward)
# ----------------------------------------------------------------------------
def adaptive_gmadl_loss(
    pred,
    true,
    *,
    beta_start=1.2,
    beta_end=1.8,
    total_epochs=20,
    current_epoch=0,
    reduction="mean",
):
    """JAX/Pallas equivalent of AdaptiveGMADLLoss.forward."""
    beta = _current_beta(beta_start, beta_end, total_epochs, current_epoch)
    if reduction in ("mean", "sum"):
        return _gmadl_reduced(pred, true, beta=beta, reduction=reduction)
    return _gmadl_none(pred, true, beta=beta)


# ----------------------------------------------------------------------------
# Main
# ----------------------------------------------------------------------------
if __name__ == "__main__":
    key = jax.random.PRNGKey(0)
    k1, k2 = jax.random.split(key)
    # small shapes consistent with a regression-style loss input
    pred = jax.random.normal(k1, (2, 4, 16, 16), dtype=jnp.float32)
    true = jax.random.normal(k2, (2, 4, 16, 16), dtype=jnp.float32)

    current_epoch = 5  # exercise the adaptive-beta path
    beta_ref = 1.2 + (1.8 - 1.2) * min(current_epoch / 19, 1.0)

    # mean
    loss = adaptive_gmadl_loss(
        pred, true,
        beta_start=1.2, beta_end=1.8, total_epochs=20,
        current_epoch=current_epoch, reduction="mean",
    )
    loss = jax.block_until_ready(loss)
    ref = jnp.mean((jnp.abs(pred - true) + EPS) ** beta_ref)
    assert jnp.allclose(loss, ref, rtol=1e-5, atol=1e-6), (loss, ref)

    # 'none'
    loss_none = jax.block_until_ready(
        adaptive_gmadl_loss(pred, true, current_epoch=current_epoch, reduction="none")
    )
    ref_none = (jnp.abs(pred - true) + EPS) ** beta_ref
    assert loss_none.shape == pred.shape
    assert jnp.allclose(loss_none, ref_none, rtol=1e-5, atol=1e-6)

    # 'sum'
    loss_sum = jax.block_until_ready(
        adaptive_gmadl_loss(pred, true, current_epoch=current_epoch, reduction="sum")
    )
    assert jnp.allclose(loss_sum, jnp.sum(ref_none), rtol=1e-5, atol=1e-4)

    # ragged size (not a multiple of 128) to exercise the in-kernel masking path
    k3, k4 = jax.random.split(k2)
    pred_r = jax.random.normal(k3, (3, 77), dtype=jnp.float32)
    true_r = jax.random.normal(k4, (3, 77), dtype=jnp.float32)
    loss_r = jax.block_until_ready(
        adaptive_gmadl_loss(pred_r, true_r, current_epoch=current_epoch, reduction="mean")
    )
    ref_r = jnp.mean((jnp.abs(pred_r - true_r) + EPS) ** beta_ref)
    assert jnp.allclose(loss_r, ref_r, rtol=1e-5, atol=1e-6), (loss_r, ref_r)

    print("KERNEL_OK")
</pallas_src>

<mosaic_0001>
module attributes {stable_mosaic.version = 11 : i64} {
  func.func @_gmadl_partial_sums_kernel(%arg0: i32, %arg1: memref<16x128xf32, #tpu.memory_space<vmem>>, %arg2: memref<16x128xf32, #tpu.memory_space<vmem>>, %arg3: memref<8x128xf32, #tpu.memory_space<vmem>>) attributes {dimension_semantics = [#tpu.dimension_semantics<parallel>], iteration_bounds = array<i64: 1>, scalar_prefetch = 0 : i64, scratch_operands = 0 : i64, tpu.core_type = #tpu.core_type<tc>, window_params = [{transform_indices = @transform_0, window_bounds = array<i64: 16, 128>}, {transform_indices = @transform_1, window_bounds = array<i64: 16, 128>}, {transform_indices = @transform_2, window_bounds = array<i64: 8, 128>}]} {
    %c0 = arith.constant 0 : index
    %c0_0 = arith.constant 0 : index
    %0 = vector.load %arg1[%c0, %c0_0] : memref<16x128xf32, #tpu.memory_space<vmem>>, vector<16x128xf32>
    %c0_1 = arith.constant 0 : index
    %c0_2 = arith.constant 0 : index
    %1 = vector.load %arg2[%c0_1, %c0_2] : memref<16x128xf32, #tpu.memory_space<vmem>>, vector<16x128xf32>
    %2 = arith.subf %0, %1 : vector<16x128xf32>
    %3 = math.absf %2 : vector<16x128xf32>
    %cst = arith.constant 9.99999993E-9 : f32
    %4 = vector.broadcast %cst : f32 to vector<16x128xf32>
    %5 = arith.addf %3, %4 : vector<16x128xf32>
    %6 = math.log %5 : vector<16x128xf32>
    %cst_3 = arith.constant 1.35789478 : f32
    %7 = vector.broadcast %cst_3 : f32 to vector<16x128xf32>
    %8 = arith.mulf %7, %6 : vector<16x128xf32>
    %9 = math.exp %8 : vector<16x128xf32>
    %10 = tpu.iota {dimensions = array<i32: 0>} : vector<16x128xi32>
    %11 = tpu.iota {dimensions = array<i32: 1>} : vector<16x128xi32>
    %c16_i32 = arith.constant 16 : i32
    %12 = arith.muli %arg0, %c16_i32 : i32
    %13 = vector.broadcast %12 : i32 to vector<16x128xi32>
    %14 = arith.addi %13, %10 : vector<16x128xi32>
    %c128_i32 = arith.constant 128 : i32
    %15 = vector.broadcast %c128_i32 : i32 to vector<16x128xi32>
    %16 = arith.muli %14, %15 : vector<16x128xi32>
    %17 = arith.addi %16, %11 : vector<16x128xi32>
    %c2048_i32 = arith.constant 2048 : i32
    %18 = vector.broadcast %c2048_i32 : i32 to vector<16x128xi32>
    %19 = arith.cmpi slt, %17, %18 : vector<16x128xi32>
    %cst_4 = arith.constant 0.000000e+00 : f32
    %20 = vector.broadcast %cst_4 : f32 to vector<16x128xf32>
    %21 = arith.select %19, %9, %20 : vector<16x128xi1>, vector<16x128xf32>
    %22 = vector.shape_cast %21 : vector<16x128xf32> to vector<2x8x128xf32>
    %cst_5 = arith.constant dense<0.000000e+00> : vector<8x128xf32>
    %23 = vector.multi_reduction <add>, %22, %cst_5 [0] : vector<2x8x128xf32> to vector<8x128xf32>
    %c0_6 = arith.constant 0 : index
    %c0_7 = arith.constant 0 : index
    %24 = vector.load %arg3[%c0_6, %c0_7] : memref<8x128xf32, #tpu.memory_space<vmem>>, vector<8x128xf32>
    tpu.vector_store %arg3[%c0_6, %c0_7], %23 {strides = array<i32>} : memref<8x128xf32, #tpu.memory_space<vmem>>, vector<8x128xf32>,
    return
  }
  func.func @transform_0(%arg0: i32) -> (i32, i32) {
    %c0_i32 = arith.constant 0 : i32
    %c0_i32_0 = arith.constant 0 : i32
    return %arg0, %c0_i32 : i32, i32
  }
  func.func @transform_1(%arg0: i32) -> (i32, i32) {
    %c0_i32 = arith.constant 0 : i32
    %c0_i32_0 = arith.constant 0 : i32
    return %arg0, %c0_i32 : i32, i32
  }
  func.func @transform_2(%arg0: i32) -> (i32, i32) {
    %c0_i32 = arith.constant 0 : i32
    %c0_i32_0 = arith.constant 0 : i32
    return %arg0, %c0_i32 : i32, i32
  }
}

</mosaic_0001>

<bundles_post_ra>
// kernel: _gmadl_reduced.1
= control target key start
LH: loop header
LB: loop body
LE: loop exit
PB: predicated region body
PF: predicated region fallthrough
CT: control target
= control target key end

     0   :  { %v31_v9 = vlaneseq  ;;  %s92_s0 = inlined_call_operand.vmem [shape: f32[16,128], index: 0, kind: input, shape index: {}]   ;;  %s93_s1 = inlined_call_operand.vmem [shape: f32[16,128], index: 1, kind: input, shape index: {}]   ;;  %s94_s2 = inlined_call_operand.vmem [shape: f32[8,128], index: 2, kind: output, shape index: {}]  }
   0x1   :  { %v11_v0 = vld [vmem:[%s92_s0] sm:$0xff]  ;;  %v12_v1 = vld [vmem:[%s92_s0 + $0x8] sm:$0xff] }
   0x2   :  { %v13_v2 = vld [vmem:[%s93_s1] sm:$0xff]  ;;  %v14_v3 = vld [vmem:[%s93_s1 + $0x8] sm:$0xff]  ;;  %v32_v11 = vshrl.u32 %v31_v9, 7  ;;  %v35_v18 = vand.u32 127, %v31_v9 }
   0x3   :  { %v15_v4 = vsub.f32 %v11_v0, %v13_v2  ;;  %v16_v5 = vsub.f32 %v12_v1, %v14_v3 }
   0x4   :  { %v33_v13 = vadd.s32 8, %v32_v11  ;;  %v40_v19 = vmul.u32 128, %v32_v11 }
   0x5   :  { %v17_v6 = vand.u32 2147483647, %v15_v4  ;;  %v18_v7 = vand.u32 2147483647, %v16_v5 }
   0x6   :  { %v41_v21 = vmul.u32 128, %v33_v13  ;;  %v42_v24 = vadd.s32 %v40_v19, %v35_v18 }
   0x7   :  { %v19_v8 = vadd.f32 1e-08, %v17_v6  ;;  %v20_v10 = vadd.f32 1e-08, %v18_v7 }
   0x8   :  { %v43_v25 = vadd.s32 %v41_v21, %v35_v18  ;;  %vm44_vm0 = vcmp.lt.s32.totalorder %v42_v24, 2048 }
   0x9   :  { %54 = vlog2.f32 %v19_v8 }
   0xa   :  { %56 = vlog2.f32 %v20_v10  ;;  %vm45_vm1 = vcmp.lt.s32.totalorder %v43_v25, 2048 }
   0xf   :  { %v55_v12 = vpop.eup %54 }
  0x10   :  { %v57_v14 = vpop.eup %56  ;;  %v22_v15 = vmul.f32 0.6931472, %v55_v12 }
  0x11   :  { %v24_v16 = vmul.f32 0.6931472, %v57_v14 }
  0x12   :  { %v25_v17 = vmul.f32 1.3578948, %v22_v15 }
  0x13   :  { %v26_v20 = vmul.f32 1.3578948, %v24_v16 }
  0x14   :  { %v27_v22 = vmul.f32 1.442695, %v25_v17 }
  0x15   :  { %v29_v23 = vmul.f32 1.442695, %v26_v20 }
  0x16   :  { %58 = vpow2.f32 %v27_v22 }
  0x17   :  { %60 = vpow2.f32 %v29_v23 }
  0x1c   :  { %v59_v26 = vpop.eup %58 }
  0x1d   :  { %v61_v27 = vpop.eup %60  ;;  %v46_v28 = vsel %vm44_vm0, %v59_v26, 0.0 }
  0x1e   :  { %v47_v29 = vsel %vm45_vm1, %v61_v27, 0.0 }
  0x1f   :  { %v48_v30 = vadd.f32 %v47_v29, %v46_v28 }
  0x21   :  { %49 = vst [vmem:[%s94_s2] sm:$0xff] %v48_v30 }

</bundles_post_ra>
